<compile_context>
chip_gen: v7x
topology: tpu7x:2x2x1
jax: 0.10.0
libtpu: 0.0.40
codegen_flags: <defaults>
</compile_context>

<pallas_src>
import functools

import jax
import jax.numpy as jnp
from jax.experimental import pallas as pl
from jax.experimental.pallas import tpu as pltpu


def _round_up(x, m):
    return (x + m - 1) // m * m


def adaptive_layer_kernel(x_ref, w1_ref, b1_ref, w2_ref, b2_ref, o_ref):
    # fc1: bf16 x bf16 -> f32 accumulate on the MXU
    h = jnp.dot(x_ref[...], w1_ref[...], preferred_element_type=jnp.float32)
    # bias + ReLU in f32 on the VPU (b1 is (1, hidden_p) -> broadcast over rows)
    h = jnp.maximum(h + b1_ref[...], jnp.float32(0.0))
    # fc2: cast activations to bf16 right before the second MXU pass
    y = jnp.dot(h.astype(jnp.bfloat16), w2_ref[...],
                preferred_element_type=jnp.float32)
    o_ref[...] = (y + b2_ref[...]).astype(o_ref.dtype)


@functools.partial(jax.jit, static_argnames=("tile_b",))
def adaptive_layer(x, w1, b1, w2, b2, *, tile_b=256):
    """Fused Linear -> ReLU -> Linear.

    x : [..., in_dim]
    w1: [in_dim, hidden]   b1: [hidden]
    w2: [hidden, out_dim]  b2: [out_dim]
    returns [..., out_dim] in float32
    """
    in_dim = x.shape[-1]
    hidden = w1.shape[1]
    out_dim = w2.shape[1]
    lead_shape = x.shape[:-1]

    # Fold all leading batch/sequence dims into one fused batch.
    xf = x.reshape(-1, in_dim)
    B = xf.shape[0]

    # Lane-dense layouts: pad hidden and out_dim up to multiples of 128.
    # Zero-padded hidden columns produce relu(0 + 0) = 0, which multiplies
    # zero-padded W2 rows -> exact result, no masking anywhere on the lane axis.
    hid_p = _round_up(hidden, 128)
    out_p = _round_up(out_dim, 128)
    if hid_p != hidden:
        w1 = jnp.pad(w1, ((0, 0), (0, hid_p - hidden)))
        b1 = jnp.pad(b1, (0, hid_p - hidden))
        w2 = jnp.pad(w2, ((0, hid_p - hidden), (0, 0)))
    if out_p != out_dim:
        w2 = jnp.pad(w2, ((0, 0), (0, out_p - out_dim)))
        b2 = jnp.pad(b2, (0, out_p - out_dim))

    # Tile the batch: cap the fused tile (vreg pressure on the f32 intermediate),
    # keep it a multiple of 8, pad B so the grid divides evenly.
    tb = min(int(tile_b), _round_up(B, 8))
    tb = max(8, _round_up(tb, 8))
    B_pad = _round_up(B, tb)
    if B_pad != B:
        xf = jnp.pad(xf, ((0, B_pad - B), (0, 0)))
    grid = (B_pad // tb,)

    # bf16 MXU operands; biases stay f32 for the f32 add path.
    xb = xf.astype(jnp.bfloat16)
    w1b = w1.astype(jnp.bfloat16)
    w2b = w2.astype(jnp.bfloat16)
    b1_2d = b1.reshape(1, hid_p).astype(jnp.float32)
    b2_2d = b2.reshape(1, out_p).astype(jnp.float32)

    # Explicit VMEM budget (double-buffered x/out tiles, single-copy weights,
    # staged f32 intermediate).
    vmem_bytes = (
        2 * tb * in_dim * 2          # x tiles (bf16, double-buffered)
        + 2 * tb * out_p * 4         # out tiles (f32, double-buffered)
        + in_dim * hid_p * 2         # W1 (single copy, bf16)
        + hid_p * out_p * 2          # W2 (single copy, bf16)
        + tb * hid_p * 4             # staged f32 intermediate h
        + (hid_p + out_p) * 4        # biases
    )
    vmem_limit = min(max(2 * vmem_bytes, 32 * 1024 * 1024), 64 * 1024 * 1024)

    cost = pl.CostEstimate(
        flops=2 * B_pad * (in_dim * hid_p + hid_p * out_p),
        bytes_accessed=(B_pad * in_dim * 2 + in_dim * hid_p * 2
                        + hid_p * out_p * 2 + B_pad * out_p * 4
                        + (hid_p + out_p) * 4),
        transcendentals=0,
    )

    out = pl.pallas_call(
        adaptive_layer_kernel,
        out_shape=jax.ShapeDtypeStruct((B_pad, out_p), jnp.float32),
        grid_spec=pltpu.PrefetchScalarGridSpec(
            num_scalar_prefetch=0,
            grid=grid,
            in_specs=[
                # x: blocked over the batch axis, auto double-buffered pipeline.
                pl.BlockSpec((tb, in_dim), lambda i: (i, 0)),
                # Grid-invariant params: single resident VMEM copy, no re-fetch.
                pl.BlockSpec(memory_space=pltpu.MemorySpace.VMEM),  # W1
                pl.BlockSpec(memory_space=pltpu.MemorySpace.VMEM),  # b1
                pl.BlockSpec(memory_space=pltpu.MemorySpace.VMEM),  # W2
                pl.BlockSpec(memory_space=pltpu.MemorySpace.VMEM),  # b2
            ],
            out_specs=pl.BlockSpec((tb, out_p), lambda i: (i, 0)),
        ),
        compiler_params=pltpu.CompilerParams(
            dimension_semantics=("parallel",),
            vmem_limit_bytes=vmem_limit,
        ),
        cost_estimate=cost,
    )(xb, w1b, b1_2d, w2b, b2_2d)

    # Strip batch / lane padding and restore leading dims.
    out = out[:B, :out_dim]
    return out.reshape(*lead_shape, out_dim)


def _trunc_normal(key, shape, std=0.02, dtype=jnp.float32):
    # PyTorch trunc_normal_ default truncates at [-2*std, 2*std]
    return std * jax.random.truncated_normal(key, -2.0, 2.0, shape, dtype)


if __name__ == "__main__":
    # Module config: in_dim=32, n_ratio=4 -> hidden=128, out_dim=16.
    # Input has leading dims (8, 32) -> 256 fused rows; tile_b=128 gives a
    # 2-step grid so the pipelined/parallel path is exercised at small shapes.
    lead, in_dim, n_ratio, out_dim = (8, 32), 32, 4.0, 16
    hidden = int(in_dim * n_ratio)

    key = jax.random.PRNGKey(0)
    kx, kw1, kw2 = jax.random.split(key, 3)

    x = jax.random.normal(kx, (*lead, in_dim), dtype=jnp.float32)

    # Deterministic params mirroring _init_weights: trunc_normal(std=0.02), bias=0.
    # PyTorch stores Linear weight as [out, in]; we keep the transposed layout [in, out].
    w1 = _trunc_normal(kw1, (in_dim, hidden))
    b1 = jnp.zeros((hidden,), jnp.float32)
    w2 = _trunc_normal(kw2, (hidden, out_dim))
    b2 = jnp.zeros((out_dim,), jnp.float32)

    out = adaptive_layer(x, w1, b1, w2, b2, tile_b=128)
    out = jax.block_until_ready(out)

    # Pure-JAX f32 reference (kernel uses bf16 MXU operands -> looser tolerance).
    ref = jnp.maximum(x @ w1 + b1, 0.0) @ w2 + b2
    assert out.shape == (*lead, out_dim)
    assert jnp.allclose(out, ref, atol=3e-3, rtol=2e-2), (
        "mismatch vs reference, max abs diff = %g" % float(jnp.max(jnp.abs(out - ref))))

    print("KERNEL_OK")
</pallas_src>

<mosaic_0001>
module attributes {stable_mosaic.version = 11 : i64} {
  func.func @adaptive_layer_kernel(%arg0: i32, %arg1: memref<128x32xbf16, #tpu.memory_space<vmem>>, %arg2: memref<32x128xbf16, #tpu.memory_space<vmem>>, %arg3: memref<1x128xf32, #tpu.memory_space<vmem>>, %arg4: memref<128x128xbf16, #tpu.memory_space<vmem>>, %arg5: memref<1x128xf32, #tpu.memory_space<vmem>>, %arg6: memref<128x128xf32, #tpu.memory_space<vmem>>) attributes {dimension_semantics = [#tpu.dimension_semantics<parallel>], iteration_bounds = array<i64: 2>, scalar_prefetch = 0 : i64, scratch_operands = 0 : i64, tpu.core_type = #tpu.core_type<tc>, window_params = [{transform_indices = @transform_0, window_bounds = array<i64: 128, 32>}, {pipeline_mode = #tpu.pipeline_mode<synchronous>, transform_indices = @transform_1, window_bounds = array<i64: 32, 128>}, {pipeline_mode = #tpu.pipeline_mode<synchronous>, transform_indices = @transform_2, window_bounds = array<i64: 1, 128>}, {pipeline_mode = #tpu.pipeline_mode<synchronous>, transform_indices = @transform_3, window_bounds = array<i64: 128, 128>}, {pipeline_mode = #tpu.pipeline_mode<synchronous>, transform_indices = @transform_4, window_bounds = array<i64: 1, 128>}, {transform_indices = @transform_5, window_bounds = array<i64: 128, 128>}]} {
    %c0 = arith.constant 0 : index
    %c0_0 = arith.constant 0 : index
    %0 = vector.load %arg1[%c0, %c0_0] : memref<128x32xbf16, #tpu.memory_space<vmem>>, vector<128x32xbf16>
    %c0_1 = arith.constant 0 : index
    %c0_2 = arith.constant 0 : index
    %1 = vector.load %arg2[%c0_1, %c0_2] : memref<32x128xbf16, #tpu.memory_space<vmem>>, vector<32x128xbf16>
    %cst = arith.constant dense<0.000000e+00> : vector<128x128xf32>
    %2 = tpu.matmul %0, %1, %cst {dimension_numbers = #tpu.dot_dimension_numbers<[1], [0], [0], [1], [0, 0, 1, 1], [], []>} : vector<128x32xbf16>, vector<32x128xbf16>, vector<128x128xf32> -> vector<128x128xf32>
    %c0_3 = arith.constant 0 : index
    %c0_4 = arith.constant 0 : index
    %3 = vector.load %arg3[%c0_3, %c0_4] : memref<1x128xf32, #tpu.memory_space<vmem>>, vector<1x128xf32>
    %4 = vector.broadcast %3 : vector<1x128xf32> to vector<128x128xf32>
    %5 = arith.addf %2, %4 : vector<128x128xf32>
    %cst_5 = arith.constant 0.000000e+00 : f32
    %6 = vector.broadcast %cst_5 : f32 to vector<128x128xf32>
    %7 = arith.maximumf %5, %6 : vector<128x128xf32>
    %8 = arith.truncf %7 : vector<128x128xf32> to vector<128x128xbf16>
    %c0_6 = arith.constant 0 : index
    %c0_7 = arith.constant 0 : index
    %9 = vector.load %arg4[%c0_6, %c0_7] : memref<128x128xbf16, #tpu.memory_space<vmem>>, vector<128x128xbf16>
    %cst_8 = arith.constant dense<0.000000e+00> : vector<128x128xf32>
    %10 = tpu.matmul %8, %9, %cst_8 {dimension_numbers = #tpu.dot_dimension_numbers<[1], [0], [0], [1], [0, 0, 1, 1], [], []>} : vector<128x128xbf16>, vector<128x128xbf16>, vector<128x128xf32> -> vector<128x128xf32>
    %c0_9 = arith.constant 0 : index
    %c0_10 = arith.constant 0 : index
    %11 = vector.load %arg5[%c0_9, %c0_10] : memref<1x128xf32, #tpu.memory_space<vmem>>, vector<1x128xf32>
    %12 = vector.broadcast %11 : vector<1x128xf32> to vector<128x128xf32>
    %13 = arith.addf %10, %12 : vector<128x128xf32>
    %c0_11 = arith.constant 0 : index
    %c0_12 = arith.constant 0 : index
    %14 = vector.load %arg6[%c0_11, %c0_12] : memref<128x128xf32, #tpu.memory_space<vmem>>, vector<128x128xf32>
    tpu.vector_store %arg6[%c0_11, %c0_12], %13 {strides = array<i32>} : memref<128x128xf32, #tpu.memory_space<vmem>>, vector<128x128xf32>,
    return
  }
  func.func @transform_0(%arg0: i32) -> (i32, i32) {
    %c0_i32 = arith.constant 0 : i32
    %c0_i32_0 = arith.constant 0 : i32
    return %arg0, %c0_i32 : i32, i32
  }
  func.func @transform_1(%arg0: i32) -> (i32, i32) {
    %c0_i32 = arith.constant 0 : i32
    %c0_i32_0 = arith.constant 0 : i32
    %c0_i32_1 = arith.constant 0 : i32
    return %c0_i32, %c0_i32_0 : i32, i32
  }
  func.func @transform_2(%arg0: i32) -> (i32, i32) {
    %c0_i32 = arith.constant 0 : i32
    %c0_i32_0 = arith.constant 0 : i32
    %c0_i32_1 = arith.constant 0 : i32
    return %c0_i32, %c0_i32_0 : i32, i32
  }
  func.func @transform_3(%arg0: i32) -> (i32, i32) {
    %c0_i32 = arith.constant 0 : i32
    %c0_i32_0 = arith.constant 0 : i32
    %c0_i32_1 = arith.constant 0 : i32
    return %c0_i32, %c0_i32_0 : i32, i32
  }
  func.func @transform_4(%arg0: i32) -> (i32, i32) {
    %c0_i32 = arith.constant 0 : i32
    %c0_i32_0 = arith.constant 0 : i32
    %c0_i32_1 = arith.constant 0 : i32
    return %c0_i32, %c0_i32_0 : i32, i32
  }
  func.func @transform_5(%arg0: i32) -> (i32, i32) {
    %c0_i32 = arith.constant 0 : i32
    %c0_i32_0 = arith.constant 0 : i32
    return %arg0, %c0_i32 : i32, i32
  }
}

</mosaic_0001>

<bundles_post_ra>
// kernel: adaptive_layer.1
= control target key start
LH: loop header
LB: loop body
LE: loop exit
PB: predicated region body
PF: predicated region fallthrough
CT: control target
= control target key end

     0   :  { %s891_s18 = smov 0   ;;  %s984_s0 = inlined_call_operand.vmem [shape: bf16[256,32], index: 0, kind: input, shape index: {}]   ;;  %s985_s1 = inlined_call_operand.vmem [shape: bf16[32,128], index: 1, kind: input, shape index: {}]   ;;  %s986_s2 = inlined_call_operand.vmem [shape: f32[1,128], index: 2, kind: input, shape index: {}]   ;;  %s987_s3 = inlined_call_operand.vmem [shape: bf16[128,128], index: 3, kind: input, shape index: {}]   ;;  %s988_s4 = inlined_call_operand.vmem [shape: f32[1,128], index: 4, kind: input, shape index: {}]   ;;  %s989_s5 = inlined_call_operand.vmem [shape: f32[256,128], index: 5, kind: output, shape index: {}]  }
   0x1 LB: > { %s694_s19 = sadd.s32 4294967295, %s859_s18   ;;  %p698_p0 = scmp.ge.s32.totalorder %s859_s18, 1  ;;  %s859_s18 = sphi %s891_s18, %s15_s18  }
   0x2   : > { %p188_p1 = scmp.lt.s32.totalorder %s859_s18, 3 }
   0x4   : > { %p189_p2 = pnand %p698_p0, %p188_p1 }
   0x5   : > { %v835_v0 = vld [vmem:[%s985_s1] sm:$0xff] (!%p189_p2)   ;;  %s699_s22 = sshll.u32 (!%p189_p2), %s694_s19, 4  ;;  %v836_v1 = vld [vmem:[%s985_s1 + $0x8] sm:$0xff] (!%p189_p2)   ;;  %vm308_vm0 = vcmask (!%p189_p2), 261120   ;;  %v847_v4 = vld [vmem:[%s987_s3 + $0x10] sm:$0xff] (!%p189_p2)  }
   0x6   : > { %192 = sbr.rel (%p189_p2) target bundleno = 482 (0x1e2), region = 40  ;;  %p217_p3 = scmp.lt.s32.totalorder (!%p189_p2), %s699_s22, 31  ;;  %759 = vmatprep.subr.bf16.mxu0 (!%p189_p2), %v835_v0  ;;  %v845_v2 = vld [vmem:[%s987_s3] sm:$0xff] (!%p189_p2)   ;;  %v846_v3 = vld [vmem:[%s987_s3 + $0x8] sm:$0xff] (!%p189_p2)   ;;  %v848_v8 = vld [vmem:[%s987_s3 + $0x18] sm:$0xff] (!%p189_p2)  }
   0x7   : > { %760 = vmatpush3.bf16.msra.mxu0 (!%p189_p2), %v835_v0  ;;  %811 = vmatprep.subr.bf16.mxu1 (!%p189_p2), %v845_v2  ;;  %v849_v10 = vld [vmem:[%s987_s3 + $0x20] sm:$0xff] (!%p189_p2)   ;;  %v850_v12 = vld [vmem:[%s987_s3 + $0x28] sm:$0xff] (!%p189_p2)   ;;  %v851_v16 = vld [vmem:[%s987_s3 + $0x30] sm:$0xff] (!%p189_p2)  }
   0x8   : > { %761 = vmatprep.subr.bf16.mxu0 (!%p189_p2), %v836_v1  ;;  %819 = vmatpush3.bf16.msra.mxu1 (!%p189_p2), %v845_v2  ;;  %v852_v17 = vld [vmem:[%s987_s3 + $0x38] sm:$0xff] (!%p189_p2)   ;;  %v703_v18 = vld [vmem:[%s986_s2] ss:$0 sm:$0xff] (!%p189_p2) }
   0x9   : > { %812 = vmatprep.subr.bf16.mxu1 (!%p189_p2), %v846_v3 }
   0xb   : > { %762 = vmatpush3.bf16.msra.mxu0 (!%p189_p2), %v836_v1 }
   0xc   : > { %779 = vmatprep.subr.bf16.mxu0 (!%p189_p2), %v845_v2  ;;  %820 = vmatpush3.bf16.msra.mxu1 (!%p189_p2), %v846_v3 }
   0xd   : > { %s991_s22 = smov (!%p217_p3, %s699_s22), 31  ;;  %813 = vmatprep.subr.bf16.mxu1 %v847_v4 }
   0xe   : > { %s700_s29 = sshll.u32 %s991_s22, 2  ;;  %s702_s24 = sshll.u32 %s991_s22, 3 }
   0xf   : > { %s917_s7 = scalar_lea.vmem %s984_s0, %s700_s29  ;;  %s963_s29 = scalar_lea.vmem %s989_s5, %s702_s24 }
  0x10   : > { %v837_v5 = vld [vmem:[%s917_s7] sm:$0xff]   ;;  %v838_v6 = vld [vmem:[%s917_s7 + $0x8] sm:$0xff]   ;;  %v839_v7 = vld [vmem:[%s917_s7 + $0x10] sm:$0xff]   ;;  %821 = vmatpush3.bf16.msra.mxu1 %v847_v4 }
  0x11   : > { %763 = vmatprep.mubr.msk.bf16.mxu0 %vm308_vm0, %v837_v5  ;;  %v840_v9 = vld [vmem:[%s917_s7 + $0x18] sm:$0xff]   ;;  %814 = vmatprep.subr.bf16.mxu1 %v848_v8  ;;  %v841_v11 = vld [vmem:[%s917_s7 + $0x20] sm:$0xff]   ;;  %v842_v13 = vld [vmem:[%s917_s7 + $0x28] sm:$0xff]  }
  0x12   : > { %764 = vmatmul.mubr.msk.bf16.vlgmr.msra.gmra.mrb[0].mxu0 %vm308_vm0, %v838_v6  ;;  %v843_v14 = vld [vmem:[%s917_s7 + $0x30] sm:$0xff]   ;;  %v844_v15 = vld [vmem:[%s917_s7 + $0x38] sm:$0xff]  }
  0x13   : > { %767 = vmatprep.mubr.msk.bf16.mxu0 %vm308_vm0, %v839_v7  ;;  %780 = vmatpush3.bf16.msra.mxu0 %v845_v2 }
  0x14   : > { %781 = vmatprep.subr.bf16.mxu0 %v846_v3  ;;  %822 = vmatpush3.bf16.msra.mxu1 %v848_v8 }
  0x15   : > { %815 = vmatprep.subr.bf16.mxu1 %v849_v10 }
  0x17   : > { %782 = vmatpush3.bf16.msra.mxu0 %v846_v3 }
  0x18   : > { %783 = vmatprep.subr.bf16.mxu0 %v847_v4  ;;  %823 = vmatpush3.bf16.msra.mxu1 %v849_v10 }
  0x19   : > { %816 = vmatprep.subr.bf16.mxu1 %v850_v12 }
  0x1a   : > { %768 = vmatmul.mubr.msk.bf16.gmra.mrb[4].mxu0 %vm308_vm0, %v840_v9 }
  0x1b   : > { %771 = vmatprep.mubr.msk.bf16.mxu0 %vm308_vm0, %v841_v11  ;;  %784 = vmatpush3.bf16.msra.mxu0 %v847_v4  ;;  %v722_v11 = vld [vmem:[%s988_s4] ss:$0 sm:$0xff] }
  0x1c   : > { %785 = vmatprep.subr.bf16.mxu0 %v848_v8  ;;  %824 = vmatpush3.bf16.msra.mxu1 %v850_v12 }
  0x1d   : > { %817 = vmatprep.subr.bf16.mxu1 %v851_v16 }
  0x1f   : > { %786 = vmatpush3.bf16.msra.mxu0 %v848_v8 }
  0x20   : > { %787 = vmatprep.subr.bf16.mxu0 %v849_v10  ;;  %825 = vmatpush3.bf16.msra.mxu1 %v851_v16 }
  0x21   : > { %818 = vmatprep.subr.bf16.mxu1 %v852_v17 }
  0x22   : > { %772 = vmatmul.mubr.msk.bf16.gmra.mrb[8].mxu0 %vm308_vm0, %v842_v13 }
  0x23   : > { %775 = vmatprep.mubr.msk.bf16.mxu0 %vm308_vm0, %v843_v14  ;;  %788 = vmatpush3.bf16.msra.mxu0 %v849_v10 }
  0x24   : > { %789 = vmatprep.subr.bf16.mxu0 %v850_v12  ;;  %826 = vmatpush3.bf16.msra.mxu1 %v852_v17 }
  0x27   : > { %790 = vmatpush3.bf16.msra.mxu0 %v850_v12 }
  0x28   : > { %791 = vmatprep.subr.bf16.mxu0 %v851_v16 }
  0x2a   : > { %776 = vmatmul.mubr.msk.bf16.gmra.mrb[12].mxu0 %vm308_vm0, %v844_v15 }
  0x2b   : > { %792 = vmatpush3.bf16.msra.mxu0 %v851_v16 }
  0x2c   : > { %793 = vmatprep.subr.bf16.mxu0 %v852_v17 }
  0x2f   : > { %794 = vmatpush3.bf16.msra.mxu0 %v852_v17 }
  0xe5   : > { %v765_v19 = vpop.f32.mrb[0].mxu0 }
  0xe6   : > { %v376_v20 = vadd.f32 %v765_v19, %v703_v18  ;;  %v367_v21 = vpop.f32.mrb[1].mxu0 }
  0xe7   : > { %v368_v22 = vadd.f32 %v703_v18, %v367_v21  ;;  %v766_v23 = vpop.f32.mrb[2].mxu0 }
  0xe8   : > { %v379_v24 = vadd.f32 %v766_v23, %v703_v18  ;;  %v370_v25 = vpop.f32.mrb[3].mxu0  ;;  %v432_v27 = vmax.f32 %v376_v20, 0.0 }
  0xe9   : > { %v371_v26 = vadd.f32 %v703_v18, %v370_v25  ;;  %v430_v29 = vmax.f32 %v368_v22, 0.0 }
  0xea   : > { %v433_v28 = vmax.f32 %v379_v24, 0.0 }
  0xeb   : > { %v431_v30 = vmax.f32 %v371_v26, 0.0 }
  0xec   : > { %v447_v31 = vpack.c.bf16 %v433_v28, %v432_v27 }
  0xed   : > { %v446_v32 = vpack.c.bf16 %v431_v30, %v430_v29  ;;  %v769_v33 = vpop.f32.mrb[4].mxu0 }
  0xee   : > { %v392_v34 = vadd.f32 %v769_v33, %v703_v18  ;;  %v383_v35 = vpop.f32.mrb[5].mxu0 }
  0xef   : > { %v384_v36 = vadd.f32 %v703_v18, %v383_v35  ;;  %v770_v37 = vpop.f32.mrb[6].mxu0  ;;  %795 = vmatprep.mubr.bf16.mxu0 %v446_v32 }
  0xf0   : > { %v395_v38 = vadd.f32 %v770_v37, %v703_v18  ;;  %v386_v39 = vpop.f32.mrb[7].mxu0  ;;  %796 = vmatmul.mubr.bf16.vlgmr.msra.gmra.mrb[16].mxu0 %v447_v31  ;;  %v436_v41 = vmax.f32 %v392_v34, 0.0 }
  0xf1   : > { %v387_v40 = vadd.f32 %v703_v18, %v386_v39  ;;  %v434_v43 = vmax.f32 %v384_v36, 0.0 }
  0xf2   : > { %v437_v42 = vmax.f32 %v395_v38, 0.0 }
  0xf3   : > { %v435_v44 = vmax.f32 %v387_v40, 0.0 }
  0xf4   : > { %v449_v45 = vpack.c.bf16 %v437_v42, %v436_v41 }
  0xf5   : > { %v773_v46 = vpop.f32.mrb[8].mxu0  ;;  %v448_v47 = vpack.c.bf16 %v435_v44, %v434_v43 }
  0xf6   : > { %v408_v48 = vadd.f32 %v773_v46, %v703_v18  ;;  %v399_v49 = vpop.f32.mrb[9].mxu0 }
  0xf7   : > { %v400_v50 = vadd.f32 %v703_v18, %v399_v49  ;;  %v774_v51 = vpop.f32.mrb[10].mxu0  ;;  %799 = vmatprep.mubr.bf16.mxu1 %v448_v47 }
  0xf8   : > { %v411_v52 = vadd.f32 %v774_v51, %v703_v18  ;;  %v402_v53 = vpop.f32.mrb[11].mxu0  ;;  %800 = vmatmul.mubr.bf16.vlgmr.msra.gmra.mrb[0].mxu1 %v449_v45  ;;  %v440_v55 = vmax.f32 %v408_v48, 0.0 }
  0xf9   : > { %v403_v54 = vadd.f32 %v703_v18, %v402_v53  ;;  %v438_v57 = vmax.f32 %v400_v50, 0.0 }
  0xfa   : > { %v441_v56 = vmax.f32 %v411_v52, 0.0 }
  0xfb   : > { %v439_v58 = vmax.f32 %v403_v54, 0.0 }
  0xfc   : > { %v451_v59 = vpack.c.bf16 %v441_v56, %v440_v55 }
  0xfd   : > { %v450_v60 = vpack.c.bf16 %v439_v58, %v438_v57  ;;  %v777_v61 = vpop.f32.mrb[12].mxu0 }
  0xfe   : > { %v424_v62 = vadd.f32 %v777_v61, %v703_v18  ;;  %v415_v63 = vpop.f32.mrb[13].mxu0 }
  0xff   : > { %v416_v0 = vadd.f32 %v703_v18, %v415_v63  ;;  %v778_v1 = vpop.f32.mrb[14].mxu0  ;;  %803 = vmatprep.mubr.bf16.mxu1 %v450_v60 }
 0x100   : > { %v427_v2 = vadd.f32 %v778_v1, %v703_v18  ;;  %v418_v3 = vpop.f32.mrb[15].mxu0  ;;  %804 = vmatmul.mubr.bf16.gmra.mrb[4].mxu1 %v451_v59  ;;  %v444_v5 = vmax.f32 %v424_v62, 0.0 }
 0x101   : > { %v419_v4 = vadd.f32 %v703_v18, %v418_v3  ;;  %v442_v7 = vmax.f32 %v416_v0, 0.0 }
 0x102   : > { %v445_v6 = vmax.f32 %v427_v2, 0.0 }
 0x103   : > { %v443_v8 = vmax.f32 %v419_v4, 0.0 }
 0x104   : > { %v453_v9 = vpack.c.bf16 %v445_v6, %v444_v5 }
 0x105   : > { %v452_v10 = vpack.c.bf16 %v443_v8, %v442_v7 }
 0x107   : > { %807 = vmatprep.mubr.bf16.mxu1 %v452_v10 }
 0x108   : > { %808 = vmatmul.mubr.bf16.gmra.mrb[8].mxu1 %v453_v9 }
 0x1c3   : > { %v797_v12 = vpop.f32.mrb[16].mxu0 }
 0x1c4   : > { %v568_v13 = vadd.f32 %v797_v12, %v722_v11  ;;  %v559_v14 = vpop.f32.mrb[17].mxu0 }
 0x1c5   : > { %v560_v15 = vadd.f32 %v722_v11, %v559_v14  ;;  %v798_v16 = vpop.f32.mrb[18].mxu0 }
 0x1c6   : > { %624 = vst [vmem:[%s963_s29 + $0x10] sm:$0xff] %v568_v13  ;;  %v571_v17 = vadd.f32 %v798_v16, %v722_v11  ;;  %v562_v18 = vpop.f32.mrb[19].mxu0 }
 0x1c7   : > { %622 = vst [vmem:[%s963_s29] sm:$0xff] %v560_v15  ;;  %v563_v19 = vadd.f32 %v722_v11, %v562_v18 }
 0x1c8   : > { %625 = vst [vmem:[%s963_s29 + $0x18] sm:$0xff] %v571_v17 }
 0x1c9   : > { %623 = vst [vmem:[%s963_s29 + $0x8] sm:$0xff] %v563_v19 }
 0x1cb   : > { %v801_v20 = vpop.f32.mrb[0].mxu1 }
 0x1cc   : > { %v584_v21 = vadd.f32 %v801_v20, %v722_v11  ;;  %v575_v22 = vpop.f32.mrb[1].mxu1 }
 0x1cd   : > { %v576_v23 = vadd.f32 %v722_v11, %v575_v22  ;;  %v802_v24 = vpop.f32.mrb[2].mxu1 }
 0x1ce   : > { %628 = vst [vmem:[%s963_s29 + $0x30] sm:$0xff] %v584_v21  ;;  %v587_v25 = vadd.f32 %v802_v24, %v722_v11  ;;  %v578_v26 = vpop.f32.mrb[3].mxu1 }
 0x1cf   : > { %626 = vst [vmem:[%s963_s29 + $0x20] sm:$0xff] %v576_v23  ;;  %v579_v27 = vadd.f32 %v722_v11, %v578_v26 }
 0x1d0   : > { %629 = vst [vmem:[%s963_s29 + $0x38] sm:$0xff] %v587_v25 }
 0x1d1   : > { %627 = vst [vmem:[%s963_s29 + $0x28] sm:$0xff] %v579_v27 }
 0x1d3   : > { %v805_v28 = vpop.f32.mrb[4].mxu1 }
 0x1d4   : > { %v600_v29 = vadd.f32 %v805_v28, %v722_v11  ;;  %v591_v30 = vpop.f32.mrb[5].mxu1 }
 0x1d5   : > { %v592_v31 = vadd.f32 %v722_v11, %v591_v30  ;;  %v806_v32 = vpop.f32.mrb[6].mxu1 }
 0x1d6   : > { %632 = vst [vmem:[%s963_s29 + $0x50] sm:$0xff] %v600_v29  ;;  %v603_v33 = vadd.f32 %v806_v32, %v722_v11  ;;  %v594_v34 = vpop.f32.mrb[7].mxu1 }
 0x1d7   : > { %630 = vst [vmem:[%s963_s29 + $0x40] sm:$0xff] %v592_v31  ;;  %v595_v35 = vadd.f32 %v722_v11, %v594_v34 }
 0x1d8   : > { %633 = vst [vmem:[%s963_s29 + $0x58] sm:$0xff] %v603_v33 }
 0x1d9   : > { %631 = vst [vmem:[%s963_s29 + $0x48] sm:$0xff] %v595_v35 }
 0x1db   : > { %v809_v36 = vpop.f32.mrb[8].mxu1 }
 0x1dc   : > { %v616_v37 = vadd.f32 %v809_v36, %v722_v11  ;;  %v607_v38 = vpop.f32.mrb[9].mxu1 }
 0x1dd   : > { %v608_v39 = vadd.f32 %v722_v11, %v607_v38  ;;  %v810_v40 = vpop.f32.mrb[10].mxu1 }
 0x1de   : > { %636 = vst [vmem:[%s963_s29 + $0x70] sm:$0xff] %v616_v37  ;;  %v619_v41 = vadd.f32 %v810_v40, %v722_v11  ;;  %v610_v42 = vpop.f32.mrb[11].mxu1 }
 0x1df   : > { %634 = vst [vmem:[%s963_s29 + $0x60] sm:$0xff] %v608_v39  ;;  %v611_v43 = vadd.f32 %v722_v11, %v610_v42 }
 0x1e0   : > { %637 = vst [vmem:[%s963_s29 + $0x78] sm:$0xff] %v619_v41 }
 0x1e1   : > { %635 = vst [vmem:[%s963_s29 + $0x68] sm:$0xff] %v611_v43 }
 0x1e2 PF: > { %s15_s18 = sadd.s32 1, %s859_s18  }
 0x1e3   : > { %p12_p4 = scmp.ge.s32.totalorder %s15_s18, 4  }
 0x1e5   :  { %14 = sbr.rel (!%p12_p4) target bundleno = 1 (0x1), region = 70 }

</bundles_post_ra>
